<compile_context>
chip_gen: v7x
topology: tpu7x:2x2x1
jax: 0.10.0
libtpu: 0.0.40
codegen_flags: <defaults>
</compile_context>

<pallas_src>
import jax
import jax.numpy as jnp
from jax.experimental import pallas as pl
from jax.experimental.pallas import tpu as pltpu


def _round_up(v, m):
    return ((v + m - 1) // m) * m


def _vmem_limit(per_step_bytes):
    # Double-buffered per-step footprint + headroom for compiler temporaries.
    return int(min(128 * 1024 * 1024, max(2 * per_step_bytes + (8 << 20), 16 << 20)))


# --------------------------- Pallas conv kernel ------------------------------
#
# One grid step == one image.  The (bf16) input slab satisfies
#   x[0, kh % stride, (kh // stride + ho) * Wo + wo, kw*C + c]
#     == x_zero_padded[stride*ho + kh, stride*wo + kw, c]
# so each of the three row-taps (kh) is a single contiguous
# [Ho*Wo, 3*C] x [3*C, cp] matmul.  The optional fused 1x1 projection shortcut
# is packed into the N dimension of the centre tap (kh == 1): one
# [Ho*Wo, 3*C] x [3*C, 2*cp] matmul whose columns split into (conv, shortcut).

def _make_conv_kernel(m_img, wo, stride, cp, with_proj):
    def kernel(*refs):
        if with_proj:
            x_ref, w_ref, wc_ref, y_ref, st_ref, ysc_ref, stsc_ref = refs
        else:
            x_ref, w_ref, y_ref, st_ref = refs
        acc = jnp.zeros((m_img, cp), jnp.float32)
        acc_sc = None
        for kh in range(3):                      # static, unrolled
            ph = kh % stride
            off = (kh // stride) * wo            # multiple of wo -> aligned slice
            lhs = x_ref[0, ph, off:off + m_img, :]        # bf16, no in-kernel cast
            if with_proj and kh == 1:
                both = jnp.dot(lhs, wc_ref[...],
                               preferred_element_type=jnp.float32)
                acc = acc + both[:, :cp]
                acc_sc = both[:, cp:]
            else:
                acc = acc + jnp.dot(lhs, w_ref[kh],
                                    preferred_element_type=jnp.float32)
        # bf16 activation writeback; BN partials from the f32 accumulator,
        # stored as two direct row stores (no sublane concat).
        y_ref[0] = acc.astype(y_ref.dtype)
        st_ref[0, 0:1, :] = jnp.sum(acc, axis=0, keepdims=True)
        st_ref[0, 1:2, :] = jnp.sum(acc * acc, axis=0, keepdims=True)
        if with_proj:
            ysc_ref[0] = acc_sc.astype(ysc_ref.dtype)
            stsc_ref[0, 0:1, :] = jnp.sum(acc_sc, axis=0, keepdims=True)
            stsc_ref[0, 1:2, :] = jnp.sum(acc_sc * acc_sc, axis=0, keepdims=True)
    return kernel


def conv_rowtap(xcol, wrow, wcomb, ho, wo, stride, cp):
    """3x3 (pad=1) conv as row-tap matmuls + partial BN stats (bf16 in/out).

    If `wcomb` is given, the 1x1/stride projection shortcut is fused into the
    centre tap as extra output columns.  Returns
    (y, stats[, y_shortcut, stats_shortcut]); y/* are bf16, stats f32.
    """
    n, nphase, rows, kdim = xcol.shape
    m_img = ho * wo
    with_proj = wcomb is not None
    kernel = _make_conv_kernel(m_img, wo, stride, cp, with_proj)

    x_spec = pl.BlockSpec((1, nphase, rows, kdim), lambda i: (i, 0, 0, 0))
    w_spec = pl.BlockSpec((3, kdim, cp), lambda i: (0, 0, 0))
    y_spec = pl.BlockSpec((1, m_img, cp), lambda i: (i, 0, 0))
    st_spec = pl.BlockSpec((1, 2, cp), lambda i: (i, 0, 0))

    in_specs = [x_spec, w_spec]
    args = [xcol, wrow]
    out_shape = [jax.ShapeDtypeStruct((n, m_img, cp), jnp.bfloat16),
                 jax.ShapeDtypeStruct((n, 2, cp), jnp.float32)]
    out_specs = [y_spec, st_spec]

    # Per-step VMEM footprint (double-buffered blocks + f32 accumulators).
    foot = (2 * (nphase * rows * kdim * 2 + m_img * cp * 2 + 2 * cp * 4)
            + 2 * (3 * kdim * cp * 2) + 2 * (m_img * cp * 4))
    if with_proj:
        in_specs.append(pl.BlockSpec((kdim, 2 * cp), lambda i: (0, 0)))
        args.append(wcomb)
        out_shape += [jax.ShapeDtypeStruct((n, m_img, cp), jnp.bfloat16),
                      jax.ShapeDtypeStruct((n, 2, cp), jnp.float32)]
        out_specs += [y_spec, st_spec]
        foot += (2 * (kdim * 2 * cp * 2 + m_img * cp * 2 + 2 * cp * 4)
                 + m_img * 2 * cp * 4)

    return pl.pallas_call(
        kernel,
        out_shape=tuple(out_shape),
        grid_spec=pltpu.PrefetchScalarGridSpec(
            num_scalar_prefetch=0,
            grid=(n,),
            in_specs=in_specs,
            out_specs=tuple(out_specs)),
        compiler_params=pltpu.CompilerParams(
            dimension_semantics=("parallel",),
            vmem_limit_bytes=_vmem_limit(foot)),
    )(*args)


# ------------------ fused bn2-affine + shortcut + residual + ReLU ------------

def _bn_residual_relu_kernel(y_ref, sy_ref, by_ref, r_ref, sr_ref, br_ref, o_ref):
    y = y_ref[...].astype(jnp.float32)
    r = r_ref[...].astype(jnp.float32)
    o_ref[...] = jnp.maximum(
        y * sy_ref[...] + by_ref[...] + r * sr_ref[...] + br_ref[...], 0.0)


def bn_residual_relu(y, sy, by, r, sr, br):
    """y, r: bf16 (M, C) streams; s*/b*: f32 (1, C); output f32 (M, C)."""
    m, c = y.shape
    # Large tiles amortize the ~0.35us per-grid-step overhead; keep the
    # double-buffered streamed footprint (~16*c bytes/row) around ~12 MiB.
    tm_cap = max(256, min(2048, ((12 << 20) // (16 * c)) // 8 * 8))
    tm = tm_cap if m >= tm_cap else _round_up(m, 8)
    mp = _round_up(m, tm)
    if mp != m:                                  # masked remainder via padding
        y = jnp.pad(y, ((0, mp - m), (0, 0)))
        r = jnp.pad(r, ((0, mp - m), (0, 0)))
    mat = pl.BlockSpec((tm, c), lambda i: (i, 0))
    vec = pl.BlockSpec((1, c), lambda i: (0, 0))
    foot = 2 * (tm * c * (2 + 2 + 4)) + 2 * 4 * (c * 4)
    out = pl.pallas_call(
        _bn_residual_relu_kernel,
        out_shape=jax.ShapeDtypeStruct((mp, c), jnp.float32),
        grid_spec=pltpu.PrefetchScalarGridSpec(
            num_scalar_prefetch=0,
            grid=(mp // tm,),
            in_specs=[mat, vec, vec, mat, vec, vec],
            out_specs=mat),
        compiler_params=pltpu.CompilerParams(
            dimension_semantics=("parallel",),
            vmem_limit_bytes=_vmem_limit(foot)),
    )(y, sy, by, r, sr, br)
    return out[:m]


# -------------------------------- JAX glue -----------------------------------

def _prep_conv_input(x_nhwc, stride):
    """Width-gathered (3x channels) + h-phase-split bf16 slab for a 3x3 conv."""
    n, h, w, c = x_nhwc.shape
    ho = (h - 1) // stride + 1
    wo = (w - 1) // stride + 1
    hq = -(-(h + 2) // stride)                    # ceil((h + 2) / stride)
    xp = jnp.pad(x_nhwc, ((0, 0), (1, stride * hq - h - 1), (1, 1), (0, 0)))
    xw = jnp.concatenate(
        [xp[:, :, kw:kw + (wo - 1) * stride + 1:stride, :] for kw in range(3)],
        axis=-1)                                  # (n, stride*hq, wo, 3c)
    xcol = xw.reshape(n, hq, stride, wo, 3 * c)
    xcol = jnp.transpose(xcol, (0, 2, 1, 3, 4)).reshape(n, stride, hq * wo, 3 * c)
    return xcol.astype(jnp.bfloat16), ho, wo      # bf16: halve the HBM stream


def _w_rowtap(w_oihw, cp):
    # (Cout, Cin, 3, 3) -> (3, 3*Cin, cp), columns ordered (kw, cin), bf16.
    cout, cin, kh, kw = w_oihw.shape
    wt = jnp.transpose(w_oihw, (2, 3, 1, 0)).reshape(kh, kw * cin, cout)
    return jnp.pad(wt, ((0, 0), (0, 0), (0, cp - cout))).astype(jnp.bfloat16)


def _w_tap1_combined(w_oihw, ws_oihw, cp):
    # Centre-tap (kh==1) conv weight and the 1x1 projection packed side by side
    # along N: (3*Cin, 2*cp) = [w1_tap1 | ws-on-centre-kw-columns], bf16.
    cout, cin, _, _ = w_oihw.shape
    wt1 = jnp.transpose(w_oihw, (2, 3, 1, 0)).reshape(3, 3 * cin, cout)[1]
    full = jnp.zeros((3 * cin, 2 * cp), jnp.float32)
    full = full.at[:, :cout].set(wt1)
    wm = jnp.transpose(ws_oihw.reshape(cout, cin))            # (cin, cout)
    full = full.at[cin:2 * cin, cp:cp + cout].set(wm)
    return full.astype(jnp.bfloat16)


def _finish_bn_stats(stats, count, gamma, beta, cp, eps=1e-5):
    # PyTorch BatchNorm2d forward in training mode: batch mean, biased variance.
    tot = jnp.sum(stats, axis=0)                          # (2, cp)
    mean = tot[0] / count
    var = jnp.maximum(tot[1] / count - mean * mean, 0.0)
    g = jnp.zeros((cp,), jnp.float32).at[:gamma.shape[0]].set(gamma)
    b = jnp.zeros((cp,), jnp.float32).at[:beta.shape[0]].set(beta)
    scale = g * jax.lax.rsqrt(var + eps)                  # 0 on padded channels
    bias = b - mean * scale
    return scale.reshape(1, cp), bias.reshape(1, cp)


def basic_block_forward(x_nchw, params, stride):
    n, cin, h, w = x_nchw.shape
    planes = params["w1"].shape[0]
    cp = _round_up(planes, 128)                  # lane-dense output channels
    has_proj = (stride != 1) or (cin != planes)
    x_nhwc = jnp.transpose(x_nchw, (0, 2, 3, 1)).astype(jnp.float32)

    # conv1 (3x3, stride, pad=1) [+ N-packed 1x1 projection shortcut] + BN stats.
    xcol1, ho, wo = _prep_conv_input(x_nhwc, stride)
    w1r = _w_rowtap(params["w1"], cp)
    wc1 = _w_tap1_combined(params["w1"], params["ws"], cp) if has_proj else None
    outs = conv_rowtap(xcol1, w1r, wc1, ho, wo, stride, cp)
    if has_proj:
        y1, st1, ysc, stsc = outs
    else:
        y1, st1 = outs
    m_img = ho * wo
    count = n * m_img
    s1, b1 = _finish_bn_stats(st1, count, params["gamma1"], params["beta1"], cp)

    # bn1 affine + ReLU folded into conv2's input gather (fused by XLA into the
    # slab construction; no standalone element-wise kernel pass).
    a1 = jnp.maximum(y1[:, :, :planes] * s1[:, :planes] + b1[:, :planes], 0.0)
    xcol2, _, _ = _prep_conv_input(a1.reshape(n, ho, wo, planes), 1)
    w2r = _w_rowtap(params["w2"], cp)
    y2, st2 = conv_rowtap(xcol2, w2r, None, ho, wo, 1, cp)
    s2, b2 = _finish_bn_stats(st2, count, params["gamma2"], params["beta2"], cp)

    # Shortcut: projection output of the conv1 kernel, or the identity input.
    if has_proj:
        ssc, bsc = _finish_bn_stats(stsc, count, params["gammas"],
                                    params["betas"], cp)
        sc = ysc.reshape(n * m_img, cp)
    else:
        sc = jnp.pad(x_nhwc.reshape(n * h * w, cin),
                     ((0, 0), (0, cp - cin))).astype(jnp.bfloat16)
        ssc = jnp.pad(jnp.ones((1, cin), jnp.float32), ((0, 0), (0, cp - cin)))
        bsc = jnp.zeros((1, cp), jnp.float32)

    # bn2 affine + shortcut affine + residual add + ReLU in one fused kernel.
    out = bn_residual_relu(y2.reshape(n * m_img, cp), s2, b2, sc, ssc, bsc)
    out = out[:, :planes].reshape(n, ho, wo, planes)
    return jnp.transpose(out, (0, 3, 1, 2))


# ----------------------------- pure-JAX reference ----------------------------

def _ref_conv(x, w, stride, pad):
    return jax.lax.conv_general_dilated(
        x, w, window_strides=(stride, stride),
        padding=((pad, pad), (pad, pad)),
        dimension_numbers=("NCHW", "OIHW", "NCHW"))


def _ref_bn(y, gamma, beta, eps=1e-5):
    mean = jnp.mean(y, axis=(0, 2, 3), keepdims=True)
    var = jnp.mean(jnp.square(y - mean), axis=(0, 2, 3), keepdims=True)
    return (y - mean) / jnp.sqrt(var + eps) * gamma.reshape(1, -1, 1, 1) \
        + beta.reshape(1, -1, 1, 1)


def basic_block_ref(x, params, stride):
    cin = x.shape[1]
    planes = params["w1"].shape[0]
    out = jax.nn.relu(_ref_bn(_ref_conv(x, params["w1"], stride, 1),
                              params["gamma1"], params["beta1"]))
    out = _ref_bn(_ref_conv(out, params["w2"], 1, 1),
                  params["gamma2"], params["beta2"])
    if stride != 1 or cin != planes:
        sc = _ref_bn(_ref_conv(x, params["ws"], stride, 0),
                     params["gammas"], params["betas"])
    else:
        sc = x
    return jax.nn.relu(out + sc)


def _make_params(key, in_planes, planes, with_proj):
    ks = jax.random.split(key, 9)
    p = {
        "w1": 0.1 * jax.random.normal(ks[0], (planes, in_planes, 3, 3), jnp.float32),
        "gamma1": 1.0 + 0.1 * jax.random.normal(ks[1], (planes,), jnp.float32),
        "beta1": 0.1 * jax.random.normal(ks[2], (planes,), jnp.float32),
        "w2": 0.1 * jax.random.normal(ks[3], (planes, planes, 3, 3), jnp.float32),
        "gamma2": 1.0 + 0.1 * jax.random.normal(ks[4], (planes,), jnp.float32),
        "beta2": 0.1 * jax.random.normal(ks[5], (planes,), jnp.float32),
    }
    if with_proj:
        p["ws"] = 0.1 * jax.random.normal(ks[6], (planes, in_planes, 1, 1), jnp.float32)
        p["gammas"] = 1.0 + 0.1 * jax.random.normal(ks[7], (planes,), jnp.float32)
        p["betas"] = 0.1 * jax.random.normal(ks[8], (planes,), jnp.float32)
    return p


if __name__ == "__main__":
    key = jax.random.PRNGKey(0)
    k1, k2, k3, k4 = jax.random.split(key, 4)
    fwd = jax.jit(basic_block_forward, static_argnames=("stride",))

    # bf16 MXU inputs and bf16 activation storage (f32 accumulation / BN math)
    # -> loosened tolerance vs the pure-f32 reference.
    TOL = 4e-2

    # Case 1: projection shortcut (stride=2, channel change), x: (2, 4, 16, 16).
    params_a = _make_params(k1, 4, 8, with_proj=True)
    x_a = jax.random.normal(k2, (2, 4, 16, 16), jnp.float32)
    out_a = jax.block_until_ready(fwd(x_a, params_a, stride=2))
    ref_a = jax.block_until_ready(basic_block_ref(x_a, params_a, 2))
    assert out_a.shape == (2, 8, 8, 8), out_a.shape
    err_a = float(jnp.max(jnp.abs(out_a - ref_a)))
    assert jnp.allclose(out_a, ref_a, atol=TOL, rtol=TOL), f"max_err={err_a}"

    # Case 2: identity shortcut (stride=1, same channels), x: (2, 8, 16, 16).
    params_b = _make_params(k3, 8, 8, with_proj=False)
    x_b = jax.random.normal(k4, (2, 8, 16, 16), jnp.float32)
    out_b = jax.block_until_ready(fwd(x_b, params_b, stride=1))
    ref_b = jax.block_until_ready(basic_block_ref(x_b, params_b, 1))
    assert out_b.shape == (2, 8, 16, 16), out_b.shape
    err_b = float(jnp.max(jnp.abs(out_b - ref_b)))
    assert jnp.allclose(out_b, ref_b, atol=TOL, rtol=TOL), f"max_err={err_b}"

    print("KERNEL_OK")
</pallas_src>

<mosaic_0001>
module attributes {stable_mosaic.version = 11 : i64} {
  func.func @kernel(%arg0: i32, %arg1: memref<1x2x72x12xbf16, #tpu.memory_space<vmem>>, %arg2: memref<3x12x128xbf16, #tpu.memory_space<vmem>>, %arg3: memref<12x256xbf16, #tpu.memory_space<vmem>>, %arg4: memref<1x64x128xbf16, #tpu.memory_space<vmem>>, %arg5: memref<1x2x128xf32, #tpu.memory_space<vmem>>, %arg6: memref<1x64x128xbf16, #tpu.memory_space<vmem>>, %arg7: memref<1x2x128xf32, #tpu.memory_space<vmem>>) attributes {dimension_semantics = [#tpu.dimension_semantics<parallel>], iteration_bounds = array<i64: 2>, scalar_prefetch = 0 : i64, scratch_operands = 0 : i64, tpu.core_type = #tpu.core_type<tc>, window_params = [{transform_indices = @transform_0, window_bounds = array<i64: 1, 2, 72, 12>}, {pipeline_mode = #tpu.pipeline_mode<synchronous>, transform_indices = @transform_1, window_bounds = array<i64: 3, 12, 128>}, {pipeline_mode = #tpu.pipeline_mode<synchronous>, transform_indices = @transform_2, window_bounds = array<i64: 12, 256>}, {transform_indices = @transform_3, window_bounds = array<i64: 1, 64, 128>}, {transform_indices = @transform_4, window_bounds = array<i64: 1, 2, 128>}, {transform_indices = @transform_5, window_bounds = array<i64: 1, 64, 128>}, {transform_indices = @transform_6, window_bounds = array<i64: 1, 2, 128>}]} {
    %cst = arith.constant 0.000000e+00 : f32
    %0 = vector.broadcast %cst : f32 to vector<64x128xf32>
    %c0 = arith.constant 0 : index
    %c0_0 = arith.constant 0 : index
    %c0_1 = arith.constant 0 : index
    %c0_2 = arith.constant 0 : index
    %1 = vector.load %arg1[%c0, %c0_0, %c0_1, %c0_2] : memref<1x2x72x12xbf16, #tpu.memory_space<vmem>>, vector<1x1x64x12xbf16>
    %2 = vector.shape_cast %1 : vector<1x1x64x12xbf16> to vector<64x12xbf16>
    %c0_3 = arith.constant 0 : index
    %c0_4 = arith.constant 0 : index
    %c0_5 = arith.constant 0 : index
    %3 = vector.load %arg2[%c0_3, %c0_4, %c0_5] : memref<3x12x128xbf16, #tpu.memory_space<vmem>>, vector<1x12x128xbf16>
    %4 = vector.shape_cast %3 : vector<1x12x128xbf16> to vector<12x128xbf16>
    %cst_6 = arith.constant dense<0.000000e+00> : vector<64x128xf32>
    %5 = tpu.matmul %2, %4, %cst_6 {dimension_numbers = #tpu.dot_dimension_numbers<[1], [0], [0], [1], [0, 0, 1, 1], [], []>} : vector<64x12xbf16>, vector<12x128xbf16>, vector<64x128xf32> -> vector<64x128xf32>
    %6 = arith.addf %0, %5 : vector<64x128xf32>
    %c0_7 = arith.constant 0 : index
    %c1 = arith.constant 1 : index
    %c0_8 = arith.constant 0 : index
    %c0_9 = arith.constant 0 : index
    %7 = vector.load %arg1[%c0_7, %c1, %c0_8, %c0_9] : memref<1x2x72x12xbf16, #tpu.memory_space<vmem>>, vector<1x1x64x12xbf16>
    %8 = vector.shape_cast %7 : vector<1x1x64x12xbf16> to vector<64x12xbf16>
    %c0_10 = arith.constant 0 : index
    %c0_11 = arith.constant 0 : index
    %9 = vector.load %arg3[%c0_10, %c0_11] : memref<12x256xbf16, #tpu.memory_space<vmem>>, vector<12x256xbf16>
    %cst_12 = arith.constant dense<0.000000e+00> : vector<64x256xf32>
    %10 = tpu.matmul %8, %9, %cst_12 {dimension_numbers = #tpu.dot_dimension_numbers<[1], [0], [0], [1], [0, 0, 1, 1], [], []>} : vector<64x12xbf16>, vector<12x256xbf16>, vector<64x256xf32> -> vector<64x256xf32>
    %11 = vector.extract_strided_slice %10 {offsets = [0, 0], sizes = [64, 128], strides = [1, 1]} : vector<64x256xf32> to vector<64x128xf32>
    %12 = arith.addf %6, %11 : vector<64x128xf32>
    %13 = vector.extract_strided_slice %10 {offsets = [0, 128], sizes = [64, 128], strides = [1, 1]} : vector<64x256xf32> to vector<64x128xf32>
    %c0_13 = arith.constant 0 : index
    %c0_14 = arith.constant 0 : index
    %c8 = arith.constant 8 : index
    %c0_15 = arith.constant 0 : index
    %14 = vector.load %arg1[%c0_13, %c0_14, %c8, %c0_15] : memref<1x2x72x12xbf16, #tpu.memory_space<vmem>>, vector<1x1x64x12xbf16>
    %15 = vector.shape_cast %14 : vector<1x1x64x12xbf16> to vector<64x12xbf16>
    %c2 = arith.constant 2 : index
    %c0_16 = arith.constant 0 : index
    %c0_17 = arith.constant 0 : index
    %16 = vector.load %arg2[%c2, %c0_16, %c0_17] : memref<3x12x128xbf16, #tpu.memory_space<vmem>>, vector<1x12x128xbf16>
    %17 = vector.shape_cast %16 : vector<1x12x128xbf16> to vector<12x128xbf16>
    %cst_18 = arith.constant dense<0.000000e+00> : vector<64x128xf32>
    %18 = tpu.matmul %15, %17, %cst_18 {dimension_numbers = #tpu.dot_dimension_numbers<[1], [0], [0], [1], [0, 0, 1, 1], [], []>} : vector<64x12xbf16>, vector<12x128xbf16>, vector<64x128xf32> -> vector<64x128xf32>
    %19 = arith.addf %12, %18 : vector<64x128xf32>
    %20 = arith.truncf %19 : vector<64x128xf32> to vector<64x128xbf16>
    %c0_19 = arith.constant 0 : index
    %c0_20 = arith.constant 0 : index
    %c0_21 = arith.constant 0 : index
    %21 = vector.load %arg4[%c0_19, %c0_20, %c0_21] : memref<1x64x128xbf16, #tpu.memory_space<vmem>>, vector<1x64x128xbf16>
    %22 = vector.shape_cast %21 : vector<1x64x128xbf16> to vector<64x128xbf16>
    %23 = vector.shape_cast %20 : vector<64x128xbf16> to vector<1x64x128xbf16>
    tpu.vector_store %arg4[%c0_19, %c0_20, %c0_21], %23 {strides = array<i32>} : memref<1x64x128xbf16, #tpu.memory_space<vmem>>, vector<1x64x128xbf16>,
    %cst_22 = arith.constant dense<0.000000e+00> : vector<128xf32>
    %24 = vector.multi_reduction <add>, %19, %cst_22 [0] : vector<64x128xf32> to vector<128xf32>
    %25 = vector.shape_cast %24 : vector<128xf32> to vector<1x128xf32>
    %c0_23 = arith.constant 0 : index
    %c0_24 = arith.constant 0 : index
    %c0_25 = arith.constant 0 : index
    %26 = vector.load %arg5[%c0_23, %c0_24, %c0_25] : memref<1x2x128xf32, #tpu.memory_space<vmem>>, vector<1x1x128xf32>
    %27 = vector.shape_cast %26 : vector<1x1x128xf32> to vector<1x128xf32>
    %28 = vector.shape_cast %25 : vector<1x128xf32> to vector<1x1x128xf32>
    tpu.vector_store %arg5[%c0_23, %c0_24, %c0_25], %28 {strides = array<i32>} : memref<1x2x128xf32, #tpu.memory_space<vmem>>, vector<1x1x128xf32>,
    %29 = arith.mulf %19, %19 : vector<64x128xf32>
    %cst_26 = arith.constant dense<0.000000e+00> : vector<128xf32>
    %30 = vector.multi_reduction <add>, %29, %cst_26 [0] : vector<64x128xf32> to vector<128xf32>
    %31 = vector.shape_cast %30 : vector<128xf32> to vector<1x128xf32>
    %c0_27 = arith.constant 0 : index
    %c1_28 = arith.constant 1 : index
    %c0_29 = arith.constant 0 : index
    %32 = vector.load %arg5[%c0_27, %c1_28, %c0_29] : memref<1x2x128xf32, #tpu.memory_space<vmem>>, vector<1x1x128xf32>
    %33 = vector.shape_cast %32 : vector<1x1x128xf32> to vector<1x128xf32>
    %34 = vector.shape_cast %31 : vector<1x128xf32> to vector<1x1x128xf32>
    tpu.vector_store %arg5[%c0_27, %c1_28, %c0_29], %34 {strides = array<i32>} : memref<1x2x128xf32, #tpu.memory_space<vmem>>, vector<1x1x128xf32>,
    %35 = arith.truncf %13 : vector<64x128xf32> to vector<64x128xbf16>
    %c0_30 = arith.constant 0 : index
    %c0_31 = arith.constant 0 : index
    %c0_32 = arith.constant 0 : index
    %36 = vector.load %arg6[%c0_30, %c0_31, %c0_32] : memref<1x64x128xbf16, #tpu.memory_space<vmem>>, vector<1x64x128xbf16>
    %37 = vector.shape_cast %36 : vector<1x64x128xbf16> to vector<64x128xbf16>
    %38 = vector.shape_cast %35 : vector<64x128xbf16> to vector<1x64x128xbf16>
    tpu.vector_store %arg6[%c0_30, %c0_31, %c0_32], %38 {strides = array<i32>} : memref<1x64x128xbf16, #tpu.memory_space<vmem>>, vector<1x64x128xbf16>,
    %cst_33 = arith.constant dense<0.000000e+00> : vector<128xf32>
    %39 = vector.multi_reduction <add>, %13, %cst_33 [0] : vector<64x128xf32> to vector<128xf32>
    %40 = vector.shape_cast %39 : vector<128xf32> to vector<1x128xf32>
    %c0_34 = arith.constant 0 : index
    %c0_35 = arith.constant 0 : index
    %c0_36 = arith.constant 0 : index
    %41 = vector.load %arg7[%c0_34, %c0_35, %c0_36] : memref<1x2x128xf32, #tpu.memory_space<vmem>>, vector<1x1x128xf32>
    %42 = vector.shape_cast %41 : vector<1x1x128xf32> to vector<1x128xf32>
    %43 = vector.shape_cast %40 : vector<1x128xf32> to vector<1x1x128xf32>
    tpu.vector_store %arg7[%c0_34, %c0_35, %c0_36], %43 {strides = array<i32>} : memref<1x2x128xf32, #tpu.memory_space<vmem>>, vector<1x1x128xf32>,
    %44 = arith.mulf %13, %13 : vector<64x128xf32>
    %cst_37 = arith.constant dense<0.000000e+00> : vector<128xf32>
    %45 = vector.multi_reduction <add>, %44, %cst_37 [0] : vector<64x128xf32> to vector<128xf32>
    %46 = vector.shape_cast %45 : vector<128xf32> to vector<1x128xf32>
    %c0_38 = arith.constant 0 : index
    %c1_39 = arith.constant 1 : index
    %c0_40 = arith.constant 0 : index
    %47 = vector.load %arg7[%c0_38, %c1_39, %c0_40] : memref<1x2x128xf32, #tpu.memory_space<vmem>>, vector<1x1x128xf32>
    %48 = vector.shape_cast %47 : vector<1x1x128xf32> to vector<1x128xf32>
    %49 = vector.shape_cast %46 : vector<1x128xf32> to vector<1x1x128xf32>
    tpu.vector_store %arg7[%c0_38, %c1_39, %c0_40], %49 {strides = array<i32>} : memref<1x2x128xf32, #tpu.memory_space<vmem>>, vector<1x1x128xf32>,
    return
  }
  func.func @transform_0(%arg0: i32) -> (i32, i32, i32, i32) {
    %c0_i32 = arith.constant 0 : i32
    %c0_i32_0 = arith.constant 0 : i32
    %c0_i32_1 = arith.constant 0 : i32
    %c0_i32_2 = arith.constant 0 : i32
    return %arg0, %c0_i32, %c0_i32_0, %c0_i32_1 : i32, i32, i32, i32
  }
  func.func @transform_1(%arg0: i32) -> (i32, i32, i32) {
    %c0_i32 = arith.constant 0 : i32
    %c0_i32_0 = arith.constant 0 : i32
    %c0_i32_1 = arith.constant 0 : i32
    %c0_i32_2 = arith.constant 0 : i32
    return %c0_i32, %c0_i32_0, %c0_i32_1 : i32, i32, i32
  }
  func.func @transform_2(%arg0: i32) -> (i32, i32) {
    %c0_i32 = arith.constant 0 : i32
    %c0_i32_0 = arith.constant 0 : i32
    %c0_i32_1 = arith.constant 0 : i32
    return %c0_i32, %c0_i32_0 : i32, i32
  }
  func.func @transform_3(%arg0: i32) -> (i32, i32, i32) {
    %c0_i32 = arith.constant 0 : i32
    %c0_i32_0 = arith.constant 0 : i32
    %c0_i32_1 = arith.constant 0 : i32
    return %arg0, %c0_i32, %c0_i32_0 : i32, i32, i32
  }
  func.func @transform_4(%arg0: i32) -> (i32, i32, i32) {
    %c0_i32 = arith.constant 0 : i32
    %c0_i32_0 = arith.constant 0 : i32
    %c0_i32_1 = arith.constant 0 : i32
    return %arg0, %c0_i32, %c0_i32_0 : i32, i32, i32
  }
  func.func @transform_5(%arg0: i32) -> (i32, i32, i32) {
    %c0_i32 = arith.constant 0 : i32
    %c0_i32_0 = arith.constant 0 : i32
    %c0_i32_1 = arith.constant 0 : i32
    return %arg0, %c0_i32, %c0_i32_0 : i32, i32, i32
  }
  func.func @transform_6(%arg0: i32) -> (i32, i32, i32) {
    %c0_i32 = arith.constant 0 : i32
    %c0_i32_0 = arith.constant 0 : i32
    %c0_i32_1 = arith.constant 0 : i32
    return %arg0, %c0_i32, %c0_i32_0 : i32, i32, i32
  }
}

module attributes {stable_mosaic.version = 11 : i64} {
  func.func @kernel(%arg0: i32, %arg1: memref<1x1x80x24xbf16, #tpu.memory_space<vmem>>, %arg2: memref<3x24x128xbf16, #tpu.memory_space<vmem>>, %arg3: memref<1x64x128xbf16, #tpu.memory_space<vmem>>, %arg4: memref<1x2x128xf32, #tpu.memory_space<vmem>>) attributes {dimension_semantics = [#tpu.dimension_semantics<parallel>], iteration_bounds = array<i64: 2>, scalar_prefetch = 0 : i64, scratch_operands = 0 : i64, tpu.core_type = #tpu.core_type<tc>, window_params = [{transform_indices = @transform_0, window_bounds = array<i64: 1, 1, 80, 24>}, {pipeline_mode = #tpu.pipeline_mode<synchronous>, transform_indices = @transform_1, window_bounds = array<i64: 3, 24, 128>}, {transform_indices = @transform_2, window_bounds = array<i64: 1, 64, 128>}, {transform_indices = @transform_3, window_bounds = array<i64: 1, 2, 128>}]} {
    %cst = arith.constant 0.000000e+00 : f32
    %0 = vector.broadcast %cst : f32 to vector<64x128xf32>
    %c0 = arith.constant 0 : index
    %c0_0 = arith.constant 0 : index
    %c0_1 = arith.constant 0 : index
    %c0_2 = arith.constant 0 : index
    %1 = vector.load %arg1[%c0, %c0_0, %c0_1, %c0_2] : memref<1x1x80x24xbf16, #tpu.memory_space<vmem>>, vector<1x1x64x24xbf16>
    %2 = vector.shape_cast %1 : vector<1x1x64x24xbf16> to vector<64x24xbf16>
    %c0_3 = arith.constant 0 : index
    %c0_4 = arith.constant 0 : index
    %c0_5 = arith.constant 0 : index
    %3 = vector.load %arg2[%c0_3, %c0_4, %c0_5] : memref<3x24x128xbf16, #tpu.memory_space<vmem>>, vector<1x24x128xbf16>
    %4 = vector.shape_cast %3 : vector<1x24x128xbf16> to vector<24x128xbf16>
    %cst_6 = arith.constant dense<0.000000e+00> : vector<64x128xf32>
    %5 = tpu.matmul %2, %4, %cst_6 {dimension_numbers = #tpu.dot_dimension_numbers<[1], [0], [0], [1], [0, 0, 1, 1], [], []>} : vector<64x24xbf16>, vector<24x128xbf16>, vector<64x128xf32> -> vector<64x128xf32>
    %6 = arith.addf %0, %5 : vector<64x128xf32>
    %c0_7 = arith.constant 0 : index
    %c0_8 = arith.constant 0 : index
    %c8 = arith.constant 8 : index
    %c0_9 = arith.constant 0 : index
    %7 = vector.load %arg1[%c0_7, %c0_8, %c8, %c0_9] : memref<1x1x80x24xbf16, #tpu.memory_space<vmem>>, vector<1x1x64x24xbf16>
    %8 = vector.shape_cast %7 : vector<1x1x64x24xbf16> to vector<64x24xbf16>
    %c1 = arith.constant 1 : index
    %c0_10 = arith.constant 0 : index
    %c0_11 = arith.constant 0 : index
    %9 = vector.load %arg2[%c1, %c0_10, %c0_11] : memref<3x24x128xbf16, #tpu.memory_space<vmem>>, vector<1x24x128xbf16>
    %10 = vector.shape_cast %9 : vector<1x24x128xbf16> to vector<24x128xbf16>
    %cst_12 = arith.constant dense<0.000000e+00> : vector<64x128xf32>
    %11 = tpu.matmul %8, %10, %cst_12 {dimension_numbers = #tpu.dot_dimension_numbers<[1], [0], [0], [1], [0, 0, 1, 1], [], []>} : vector<64x24xbf16>, vector<24x128xbf16>, vector<64x128xf32> -> vector<64x128xf32>
    %12 = arith.addf %6, %11 : vector<64x128xf32>
    %c0_13 = arith.constant 0 : index
    %c0_14 = arith.constant 0 : index
    %c16 = arith.constant 16 : index
    %c0_15 = arith.constant 0 : index
    %13 = vector.load %arg1[%c0_13, %c0_14, %c16, %c0_15] : memref<1x1x80x24xbf16, #tpu.memory_space<vmem>>, vector<1x1x64x24xbf16>
    %14 = vector.shape_cast %13 : vector<1x1x64x24xbf16> to vector<64x24xbf16>
    %c2 = arith.constant 2 : index
    %c0_16 = arith.constant 0 : index
    %c0_17 = arith.constant 0 : index
    %15 = vector.load %arg2[%c2, %c0_16, %c0_17] : memref<3x24x128xbf16, #tpu.memory_space<vmem>>, vector<1x24x128xbf16>
    %16 = vector.shape_cast %15 : vector<1x24x128xbf16> to vector<24x128xbf16>
    %cst_18 = arith.constant dense<0.000000e+00> : vector<64x128xf32>
    %17 = tpu.matmul %14, %16, %cst_18 {dimension_numbers = #tpu.dot_dimension_numbers<[1], [0], [0], [1], [0, 0, 1, 1], [], []>} : vector<64x24xbf16>, vector<24x128xbf16>, vector<64x128xf32> -> vector<64x128xf32>
    %18 = arith.addf %12, %17 : vector<64x128xf32>
    %19 = arith.truncf %18 : vector<64x128xf32> to vector<64x128xbf16>
    %c0_19 = arith.constant 0 : index
    %c0_20 = arith.constant 0 : index
    %c0_21 = arith.constant 0 : index
    %20 = vector.load %arg3[%c0_19, %c0_20, %c0_21] : memref<1x64x128xbf16, #tpu.memory_space<vmem>>, vector<1x64x128xbf16>
    %21 = vector.shape_cast %20 : vector<1x64x128xbf16> to vector<64x128xbf16>
    %22 = vector.shape_cast %19 : vector<64x128xbf16> to vector<1x64x128xbf16>
    tpu.vector_store %arg3[%c0_19, %c0_20, %c0_21], %22 {strides = array<i32>} : memref<1x64x128xbf16, #tpu.memory_space<vmem>>, vector<1x64x128xbf16>,
    %cst_22 = arith.constant dense<0.000000e+00> : vector<128xf32>
    %23 = vector.multi_reduction <add>, %18, %cst_22 [0] : vector<64x128xf32> to vector<128xf32>
    %24 = vector.shape_cast %23 : vector<128xf32> to vector<1x128xf32>
    %c0_23 = arith.constant 0 : index
    %c0_24 = arith.constant 0 : index
    %c0_25 = arith.constant 0 : index
    %25 = vector.load %arg4[%c0_23, %c0_24, %c0_25] : memref<1x2x128xf32, #tpu.memory_space<vmem>>, vector<1x1x128xf32>
    %26 = vector.shape_cast %25 : vector<1x1x128xf32> to vector<1x128xf32>
    %27 = vector.shape_cast %24 : vector<1x128xf32> to vector<1x1x128xf32>
    tpu.vector_store %arg4[%c0_23, %c0_24, %c0_25], %27 {strides = array<i32>} : memref<1x2x128xf32, #tpu.memory_space<vmem>>, vector<1x1x128xf32>,
    %28 = arith.mulf %18, %18 : vector<64x128xf32>
    %cst_26 = arith.constant dense<0.000000e+00> : vector<128xf32>
    %29 = vector.multi_reduction <add>, %28, %cst_26 [0] : vector<64x128xf32> to vector<128xf32>
    %30 = vector.shape_cast %29 : vector<128xf32> to vector<1x128xf32>
    %c0_27 = arith.constant 0 : index
    %c1_28 = arith.constant 1 : index
    %c0_29 = arith.constant 0 : index
    %31 = vector.load %arg4[%c0_27, %c1_28, %c0_29] : memref<1x2x128xf32, #tpu.memory_space<vmem>>, vector<1x1x128xf32>
    %32 = vector.shape_cast %31 : vector<1x1x128xf32> to vector<1x128xf32>
    %33 = vector.shape_cast %30 : vector<1x128xf32> to vector<1x1x128xf32>
    tpu.vector_store %arg4[%c0_27, %c1_28, %c0_29], %33 {strides = array<i32>} : memref<1x2x128xf32, #tpu.memory_space<vmem>>, vector<1x1x128xf32>,
    return
  }
  func.func @transform_0(%arg0: i32) -> (i32, i32, i32, i32) {
    %c0_i32 = arith.constant 0 : i32
    %c0_i32_0 = arith.constant 0 : i32
    %c0_i32_1 = arith.constant 0 : i32
    %c0_i32_2 = arith.constant 0 : i32
    return %arg0, %c0_i32, %c0_i32_0, %c0_i32_1 : i32, i32, i32, i32
  }
  func.func @transform_1(%arg0: i32) -> (i32, i32, i32) {
    %c0_i32 = arith.constant 0 : i32
    %c0_i32_0 = arith.constant 0 : i32
    %c0_i32_1 = arith.constant 0 : i32
    %c0_i32_2 = arith.constant 0 : i32
    return %c0_i32, %c0_i32_0, %c0_i32_1 : i32, i32, i32
  }
  func.func @transform_2(%arg0: i32) -> (i32, i32, i32) {
    %c0_i32 = arith.constant 0 : i32
    %c0_i32_0 = arith.constant 0 : i32
    %c0_i32_1 = arith.constant 0 : i32
    return %arg0, %c0_i32, %c0_i32_0 : i32, i32, i32
  }
  func.func @transform_3(%arg0: i32) -> (i32, i32, i32) {
    %c0_i32 = arith.constant 0 : i32
    %c0_i32_0 = arith.constant 0 : i32
    %c0_i32_1 = arith.constant 0 : i32
    return %arg0, %c0_i32, %c0_i32_0 : i32, i32, i32
  }
}

module attributes {stable_mosaic.version = 11 : i64} {
  func.func @_bn_residual_relu_kernel(%arg0: i32, %arg1: memref<128x128xbf16, #tpu.memory_space<vmem>>, %arg2: memref<1x128xf32, #tpu.memory_space<vmem>>, %arg3: memref<1x128xf32, #tpu.memory_space<vmem>>, %arg4: memref<128x128xbf16, #tpu.memory_space<vmem>>, %arg5: memref<1x128xf32, #tpu.memory_space<vmem>>, %arg6: memref<1x128xf32, #tpu.memory_space<vmem>>, %arg7: memref<128x128xf32, #tpu.memory_space<vmem>>) attributes {dimension_semantics = [#tpu.dimension_semantics<parallel>], iteration_bounds = array<i64: 1>, scalar_prefetch = 0 : i64, scratch_operands = 0 : i64, tpu.core_type = #tpu.core_type<tc>, window_params = [{transform_indices = @transform_0, window_bounds = array<i64: 128, 128>}, {pipeline_mode = #tpu.pipeline_mode<synchronous>, transform_indices = @transform_1, window_bounds = array<i64: 1, 128>}, {pipeline_mode = #tpu.pipeline_mode<synchronous>, transform_indices = @transform_2, window_bounds = array<i64: 1, 128>}, {transform_indices = @transform_3, window_bounds = array<i64: 128, 128>}, {pipeline_mode = #tpu.pipeline_mode<synchronous>, transform_indices = @transform_4, window_bounds = array<i64: 1, 128>}, {pipeline_mode = #tpu.pipeline_mode<synchronous>, transform_indices = @transform_5, window_bounds = array<i64: 1, 128>}, {transform_indices = @transform_6, window_bounds = array<i64: 128, 128>}]} {
    %c0 = arith.constant 0 : index
    %c0_0 = arith.constant 0 : index
    %0 = vector.load %arg1[%c0, %c0_0] : memref<128x128xbf16, #tpu.memory_space<vmem>>, vector<128x128xbf16>
    %1 = arith.extf %0 : vector<128x128xbf16> to vector<128x128xf32>
    %c0_1 = arith.constant 0 : index
    %c0_2 = arith.constant 0 : index
    %2 = vector.load %arg4[%c0_1, %c0_2] : memref<128x128xbf16, #tpu.memory_space<vmem>>, vector<128x128xbf16>
    %3 = arith.extf %2 : vector<128x128xbf16> to vector<128x128xf32>
    %c0_3 = arith.constant 0 : index
    %c0_4 = arith.constant 0 : index
    %4 = vector.load %arg2[%c0_3, %c0_4] : memref<1x128xf32, #tpu.memory_space<vmem>>, vector<1x128xf32>
    %5 = vector.broadcast %4 : vector<1x128xf32> to vector<128x128xf32>
    %6 = arith.mulf %1, %5 : vector<128x128xf32>
    %c0_5 = arith.constant 0 : index
    %c0_6 = arith.constant 0 : index
    %7 = vector.load %arg3[%c0_5, %c0_6] : memref<1x128xf32, #tpu.memory_space<vmem>>, vector<1x128xf32>
    %8 = vector.broadcast %7 : vector<1x128xf32> to vector<128x128xf32>
    %9 = arith.addf %6, %8 : vector<128x128xf32>
    %c0_7 = arith.constant 0 : index
    %c0_8 = arith.constant 0 : index
    %10 = vector.load %arg5[%c0_7, %c0_8] : memref<1x128xf32, #tpu.memory_space<vmem>>, vector<1x128xf32>
    %11 = vector.broadcast %10 : vector<1x128xf32> to vector<128x128xf32>
    %12 = arith.mulf %3, %11 : vector<128x128xf32>
    %13 = arith.addf %9, %12 : vector<128x128xf32>
    %c0_9 = arith.constant 0 : index
    %c0_10 = arith.constant 0 : index
    %14 = vector.load %arg6[%c0_9, %c0_10] : memref<1x128xf32, #tpu.memory_space<vmem>>, vector<1x128xf32>
    %15 = vector.broadcast %14 : vector<1x128xf32> to vector<128x128xf32>
    %16 = arith.addf %13, %15 : vector<128x128xf32>
    %cst = arith.constant 0.000000e+00 : f32
    %17 = vector.broadcast %cst : f32 to vector<128x128xf32>
    %18 = arith.maximumf %16, %17 : vector<128x128xf32>
    %c0_11 = arith.constant 0 : index
    %c0_12 = arith.constant 0 : index
    %19 = vector.load %arg7[%c0_11, %c0_12] : memref<128x128xf32, #tpu.memory_space<vmem>>, vector<128x128xf32>
    tpu.vector_store %arg7[%c0_11, %c0_12], %18 {strides = array<i32>} : memref<128x128xf32, #tpu.memory_space<vmem>>, vector<128x128xf32>,
    return
  }
  func.func @transform_0(%arg0: i32) -> (i32, i32) {
    %c0_i32 = arith.constant 0 : i32
    %c0_i32_0 = arith.constant 0 : i32
    return %arg0, %c0_i32 : i32, i32
  }
  func.func @transform_1(%arg0: i32) -> (i32, i32) {
    %c0_i32 = arith.constant 0 : i32
    %c0_i32_0 = arith.constant 0 : i32
    %c0_i32_1 = arith.constant 0 : i32
    return %c0_i32, %c0_i32_0 : i32, i32
  }
  func.func @transform_2(%arg0: i32) -> (i32, i32) {
    %c0_i32 = arith.constant 0 : i32
    %c0_i32_0 = arith.constant 0 : i32
    %c0_i32_1 = arith.constant 0 : i32
    return %c0_i32, %c0_i32_0 : i32, i32
  }
  func.func @transform_3(%arg0: i32) -> (i32, i32) {
    %c0_i32 = arith.constant 0 : i32
    %c0_i32_0 = arith.constant 0 : i32
    return %arg0, %c0_i32 : i32, i32
  }
  func.func @transform_4(%arg0: i32) -> (i32, i32) {
    %c0_i32 = arith.constant 0 : i32
    %c0_i32_0 = arith.constant 0 : i32
    %c0_i32_1 = arith.constant 0 : i32
    return %c0_i32, %c0_i32_0 : i32, i32
  }
  func.func @transform_5(%arg0: i32) -> (i32, i32) {
    %c0_i32 = arith.constant 0 : i32
    %c0_i32_0 = arith.constant 0 : i32
    %c0_i32_1 = arith.constant 0 : i32
    return %c0_i32, %c0_i32_0 : i32, i32
  }
  func.func @transform_6(%arg0: i32) -> (i32, i32) {
    %c0_i32 = arith.constant 0 : i32
    %c0_i32_0 = arith.constant 0 : i32
    return %arg0, %c0_i32 : i32, i32
  }
}

</mosaic_0001>

<bundles_post_ra>
// kernel: basic_block_forward.3
= control target key start
LH: loop header
LB: loop body
LE: loop exit
PB: predicated region body
PF: predicated region fallthrough
CT: control target
= control target key end

     0   :  { %s1195_s21 = smov 0   ;;  %s1272_s0 = inlined_call_operand.vmem [shape: bf16[2,2,72,12], index: 0, kind: input, shape index: {}]   ;;  %s1273_s1 = inlined_call_operand.vmem [shape: bf16[3,12,128], index: 1, kind: input, shape index: {}]   ;;  %s1274_s2 = inlined_call_operand.vmem [shape: bf16[12,256], index: 2, kind: input, shape index: {}]   ;;  %s1275_s3 = inlined_call_operand.vmem [shape: bf16[2,64,128], index: 3, kind: output, shape index: {0}]   ;;  %s1276_s4 = inlined_call_operand.vmem [shape: f32[2,2,128], index: 4, kind: output, shape index: {1}]   ;;  %s1277_s5 = inlined_call_operand.vmem [shape: bf16[2,64,128], index: 5, kind: output, shape index: {2}]   ;;  %s1278_s6 = inlined_call_operand.vmem [shape: f32[2,2,128], index: 6, kind: output, shape index: {3}]  }
   0x1 LB: > { %s959_s22 = sadd.s32 4294967295, %s1157_s21   ;;  %p963_p0 = scmp.ge.s32.totalorder %s1157_s21, 1  ;;  %s1157_s21 = sphi %s1195_s21, %s17_s21  }
   0x2   : > { %p219_p1 = scmp.lt.s32.totalorder %s1157_s21, 3 }
   0x4   : > { %p220_p2 = pnand %p963_p0, %p219_p1 }
   0x5   : > { %v1134_v0 = vld [vmem:[%s1274_s2 + $0x4] ss:$8 sps:$4 sm:$0x3f] (!%p220_p2)   ;;  %vm348_vm0 = vcmask (!%p220_p2), 1045504   ;;  %v1159_v3 = vmov (!%p220_p2), 0   ;;  %p262_p3 = scmp.lt.s32.totalorder (!%p220_p2), %s959_s22, 1 }
   0x6   : > { %223 = sbr.rel (%p220_p2) target bundleno = 282 (0x11a), region = 32  ;;  %985 = vmatprep.subr.msk.bf16.mxu0 (!%p220_p2), %vm348_vm0, %v1134_v0  ;;  %v1136_v1 = vld [vmem:[%s1273_s1] sm:$0x3f] (!%p220_p2)   ;;  %387 = vmatprep.mubr.bf16.mxu0 (!%p220_p2), %v1159_v3  ;;  %v1140_v6 = vld [vmem:[%s1273_s1 + $0x10] sm:$0x3f] (!%p220_p2)   ;;  %vm335_vm1 = vcmask (!%p220_p2), 97280  }
   0x7   : > { %v1137_v2 = vld [vmem:[%s1274_s2] ss:$8 sps:$4 sm:$0x3f] (!%p220_p2)   ;;  %1122 = vmatprep.subr.msk.bf16.mxu1 (!%p220_p2), %vm348_vm0, %v1136_v1  ;;  %v466_v5 = vsel (!%p220_p2), %vm348_vm0, %v1136_v1, 0  ;;  %v582_v10 = vsel (!%p220_p2), %vm348_vm0, %v1140_v6, 0 }
   0x8   : > { %v350_v4 = vsel (!%p220_p2), %vm348_vm0, %v1137_v2, 0  ;;  %1103 = vmatpush3.bf16.msra.mxu1 (!%p220_p2), %v466_v5 }
   0x9   : > { %356 = vmatpush1.bf16.msra.mxu0 (!%p220_p2), %v350_v4  ;;  %1123 = vmatprep.subr.msk.bf16.mxu1 (!%p220_p2), %vm348_vm0, %v1140_v6 }
   0xd   : > { %s1280_s22 = smov (!%p262_p3, %s959_s22), 1 }
   0xe   : > { %s1124_s7 = smul.u32 72, %s1280_s22  ;;  %s1028_s11 = sshll.u32 %s1280_s22, 5 }
   0xf   : > { %s1245_s14 = scalar_lea.vmem %s1277_s5, %s1028_s11  ;;  %s1255_s17 = scalar_lea.vmem %s1275_s3, %s1028_s11 }
  0x10   : > { %s266_s10 = scalar_lea.vmem %s1272_s0, %s1124_s7  ;;  %s967_s18 = sshll.u32 %s1280_s22, 1 }
  0x11   : > { %v1138_v7 = vld [vmem:[%s266_s10 + $0x24] sm:$0xff]   ;;  %v1143_v11 = vld [vmem:[%s266_s10 + $0x10] sm:$0xff]   ;;  %v1144_v13 = vld [vmem:[%s266_s10 + $0x18] sm:$0xff]   ;;  %s284_s23 = scalar_lea.vmem %s1278_s6, %s967_s18  ;;  %s275_s25 = scalar_lea.vmem %s1276_s4, %s967_s18 }
  0x12   : > { %v1139_v8 = vld [vmem:[%s266_s10] sm:$0xff]   ;;  %986 = vmatmul.mubr.msk.bf16.vlgmr.msra.gmra.mrb[0].mxu0 %vm335_vm1, %v1138_v7  ;;  %v1141_v9 = vld [vmem:[%s266_s10 + $0x8] sm:$0xff]   ;;  %v1145_v15 = vld [vmem:[%s266_s10 + $0x34] sm:$0xff]  }
  0x13   : > { %1104 = vmatprep.mubr.msk.bf16.mxu1 %vm335_vm1, %v1139_v8  ;;  %397 = vmatprep.mubr.bf16.mxu0 %v1159_v3  ;;  %v1142_v12 = vld [vmem:[%s266_s10 + $0x2c] sm:$0xff]   ;;  %v1146_v14 = vld [vmem:[%s266_s10 + $0x4] sm:$0xff]   ;;  %v1149_v17 = vld [vmem:[%s266_s10 + $0x14] sm:$0xff]  }
  0x14   : > { %1105 = vmatmul.mubr.msk.bf16.vlgmr.msra.gmra.mrb[0].mxu1 %vm335_vm1, %v1141_v9  ;;  %v1147_v16 = vld [vmem:[%s266_s10 + $0xc] sm:$0xff]   ;;  %v1148_v18 = vld [vmem:[%s266_s10 + $0x3c] sm:$0xff]  }
  0x15   : > { %1113 = vmatpush3.bf16.msra.mxu1 %v582_v10  ;;  %1108 = vmatprep.mubr.msk.bf16.mxu1 %vm335_vm1, %v1143_v11  ;;  %v1150_v19 = vld [vmem:[%s266_s10 + $0x1c] sm:$0xff]  }
  0x1a   : > { %987 = vmatmul.mubr.msk.bf16.gmra.mrb[4].mxu0 %vm335_vm1, %v1142_v12 }
  0x1b   : > { %407 = vmatprep.mubr.bf16.mxu0 %v1159_v3 }
  0x1c   : > { %1109 = vmatmul.mubr.msk.bf16.gmra.mrb[4].mxu1 %vm335_vm1, %v1144_v13 }
  0x1d   : > { %1114 = vmatprep.mubr.msk.bf16.mxu1 %vm335_vm1, %v1146_v14 }
  0x22   : > { %988 = vmatmul.mubr.msk.bf16.gmra.mrb[8].mxu0 %vm335_vm1, %v1145_v15 }
  0x23   : > { %417 = vmatprep.mubr.bf16.mxu0 %v1159_v3 }
  0x24   : > { %1115 = vmatmul.mubr.msk.bf16.vlgmr.msra.gmra.mrb[8].mxu1 %vm335_vm1, %v1147_v16 }
  0x25   : > { %1118 = vmatprep.mubr.msk.bf16.mxu1 %vm335_vm1, %v1149_v17 }
  0x2a   : > { %989 = vmatmul.mubr.msk.bf16.gmra.mrb[12].mxu0 %vm335_vm1, %v1148_v18 }
  0x2c   : > { %1119 = vmatmul.mubr.msk.bf16.gmra.mrb[12].mxu1 %vm335_vm1, %v1150_v19 }
  0xe5   : > { %v389_v20 = vpop.f32.mrb[0].mxu0 }
  0xe6   : > { %v391_v21 = vpop.f32.mrb[1].mxu0 }
  0xe7   : > { %v1106_v22 = vpop.f32.mrb[0].mxu1  ;;  %v787_v23 = vmul.f32 %v391_v21, %v391_v21  ;;  %v393_v24 = vpop.f32.mrb[2].mxu0 }
  0xe8   : > { %v502_v25 = vpop.f32.mrb[1].mxu1  ;;  %v395_v26 = vpop.f32.mrb[3].mxu0 }
  0xe9   : > { %v503_v27 = vadd.f32 %v502_v25, %v389_v20  ;;  %v1107_v28 = vpop.f32.mrb[2].mxu1  ;;  %v1069_v29 = vpack.c.bf16 %v395_v26, %v391_v21  ;;  %v773_v30 = vadd.f32 %v395_v26, %v391_v21  ;;  %v788_v31 = vmul.f32 %v395_v26, %v395_v26 }
  0xea   : > { %v505_v32 = vpop.f32.mrb[3].mxu1 }
  0xeb   : > { %1070 = vst [vmem:[%s1245_s14] sm:$0xff] %v1069_v29   ;;  %v795_v33 = vadd.f32 %v788_v31, %v787_v23  ;;  %v506_v34 = vadd.f32 %v505_v32, %v393_v24 }
  0xed   : > { %v399_v35 = vpop.f32.mrb[4].mxu0 }
  0xee   : > { %v511_v36 = vadd.f32 %v1106_v22, %v399_v35  ;;  %v401_v37 = vpop.f32.mrb[5].mxu0 }
  0xef   : > { %v774_v38 = vadd.f32 %v773_v30, %v401_v37  ;;  %v789_v39 = vmul.f32 %v401_v37, %v401_v37  ;;  %v1110_v40 = vpop.f32.mrb[4].mxu1  ;;  %v403_v41 = vpop.f32.mrb[6].mxu0 }
  0xf0   : > { %v514_v42 = vadd.f32 %v1107_v28, %v403_v41  ;;  %v518_v43 = vpop.f32.mrb[5].mxu1  ;;  %v405_v44 = vpop.f32.mrb[7].mxu0 }
  0xf1   : > { %v796_v45 = vadd.f32 %v795_v33, %v789_v39  ;;  %v1074_v46 = vpack.c.bf16 %v405_v44, %v401_v37  ;;  %v775_v47 = vadd.f32 %v774_v38, %v405_v44  ;;  %v790_v48 = vmul.f32 %v405_v44, %v405_v44  ;;  %v1111_v49 = vpop.f32.mrb[6].mxu1 }
  0xf2   : > { %v521_v50 = vpop.f32.mrb[7].mxu1 }
  0xf3   : > { %1089 = vst [vmem:[%s1245_s14 + $0x8] sm:$0xff] %v1074_v46   ;;  %v797_v51 = vadd.f32 %v796_v45, %v790_v48 }
  0xf5   : > { %v409_v52 = vpop.f32.mrb[8].mxu0 }
  0xf6   : > { %v519_v53 = vadd.f32 %v518_v43, %v409_v52  ;;  %v411_v54 = vpop.f32.mrb[9].mxu0 }
  0xf7   : > { %v776_v55 = vadd.f32 %v775_v47, %v411_v54  ;;  %v791_v56 = vmul.f32 %v411_v54, %v411_v54  ;;  %v1116_v57 = vpop.f32.mrb[8].mxu1  ;;  %v413_v58 = vpop.f32.mrb[10].mxu0 }
  0xf8   : > { %v651_v59 = vadd.f32 %v1116_v57, %v511_v36  ;;  %v522_v60 = vadd.f32 %v521_v50, %v413_v58  ;;  %v618_v61 = vpop.f32.mrb[9].mxu1  ;;  %v415_v62 = vpop.f32.mrb[11].mxu0 }
  0xf9   : > { %v798_v63 = vadd.f32 %v797_v51, %v791_v56  ;;  %v649_v0 = vadd.f32 %v618_v61, %v503_v27  ;;  %v1079_v1 = vpack.c.bf16 %v415_v62, %v411_v54  ;;  %v777_v2 = vadd.f32 %v776_v55, %v415_v62  ;;  %v1117_v3 = vpop.f32.mrb[10].mxu1 }
  0xfa   : > { %v792_v4 = vmul.f32 %v415_v62, %v415_v62  ;;  %v652_v5 = vadd.f32 %v1117_v3, %v514_v42  ;;  %v621_v6 = vpop.f32.mrb[11].mxu1  ;;  %v713_v15 = vmul.f32 %v651_v59, %v651_v59 }
  0xfb   : > { %1090 = vst [vmem:[%s1245_s14 + $0x10] sm:$0xff] %v1079_v1   ;;  %v650_v7 = vadd.f32 %v621_v6, %v506_v34  ;;  %v711_v10 = vmul.f32 %v649_v0, %v649_v0 }
  0xfc   : > { %v799_v8 = vadd.f32 %v798_v63, %v792_v4  ;;  %v1054_v9 = vpack.c.bf16 %v652_v5, %v651_v59  ;;  %v714_v24 = vmul.f32 %v652_v5, %v652_v5 }
  0xfd   : > { %v1049_v11 = vpack.c.bf16 %v650_v7, %v649_v0  ;;  %v697_v12 = vadd.f32 %v650_v7, %v649_v0  ;;  %v712_v13 = vmul.f32 %v650_v7, %v650_v7  ;;  %v419_v14 = vpop.f32.mrb[12].mxu0 }
  0xfe   : > { %1086 = vst [vmem:[%s1255_s17 + $0x8] sm:$0xff] %v1054_v9   ;;  %v527_v16 = vadd.f32 %v1110_v40, %v419_v14  ;;  %v421_v17 = vpop.f32.mrb[13].mxu0 }
  0xff   : > { %1050 = vst [vmem:[%s1255_s17] sm:$0xff] %v1049_v11   ;;  %v698_v18 = vadd.f32 %v697_v12, %v651_v59  ;;  %v719_v19 = vadd.f32 %v712_v13, %v711_v10  ;;  %v778_v20 = vadd.f32 %v777_v2, %v421_v17  ;;  %v793_v21 = vmul.f32 %v421_v17, %v421_v17  ;;  %v1120_v22 = vpop.f32.mrb[12].mxu1  ;;  %v423_v23 = vpop.f32.mrb[14].mxu0 }
 0x100   : > { %v655_v25 = vadd.f32 %v1120_v22, %v527_v16  ;;  %v530_v26 = vadd.f32 %v1111_v49, %v423_v23  ;;  %v634_v27 = vpop.f32.mrb[13].mxu1  ;;  %v425_v28 = vpop.f32.mrb[15].mxu0 }
 0x101   : > { %v720_v29 = vadd.f32 %v719_v19, %v713_v15  ;;  %v800_v30 = vadd.f32 %v799_v8, %v793_v21  ;;  %v653_v31 = vadd.f32 %v634_v27, %v519_v53  ;;  %v699_v32 = vadd.f32 %v698_v18, %v652_v5  ;;  %v1121_v33 = vpop.f32.mrb[14].mxu1 }
 0x102   : > { %v1084_v34 = vpack.c.bf16 %v425_v28, %v421_v17  ;;  %v779_v35 = vadd.f32 %v778_v20, %v425_v28  ;;  %v794_v36 = vmul.f32 %v425_v28, %v425_v28  ;;  %v637_v37 = vpop.f32.mrb[15].mxu1  ;;  %v656_v41 = vadd.f32 %v1121_v33, %v530_v26 }
 0x103   : > { %v700_v38 = vadd.f32 %v699_v32, %v653_v31  ;;  %v715_v39 = vmul.f32 %v653_v31, %v653_v31  ;;  %v721_v40 = vadd.f32 %v720_v29, %v714_v24  ;;  %v654_v44 = vadd.f32 %v637_v37, %v522_v60 }
 0x104   : > { %1091 = vst [vmem:[%s1245_s14 + $0x18] sm:$0xff] %v1084_v34   ;;  %v780_v42 = vrot.slane %v779_v35, 4  ;;  %v801_v43 = vadd.f32 %v800_v30, %v794_v36  ;;  %v1064_v46 = vpack.c.bf16 %v656_v41, %v655_v25  ;;  %v717_v55 = vmul.f32 %v655_v25, %v655_v25 }
 0x105   : > { %v722_v45 = vadd.f32 %v721_v40, %v715_v39  ;;  %v1059_v49 = vpack.c.bf16 %v654_v44, %v653_v31  ;;  %v701_v50 = vadd.f32 %v700_v38, %v654_v44  ;;  %v716_v51 = vmul.f32 %v654_v44, %v654_v44 }
 0x106   : > { %v781_v47 = vadd.f32 %v780_v42, %v779_v35  ;;  %v802_v48 = vrot.slane %v801_v43, 4  ;;  %1088 = vst [vmem:[%s1255_s17 + $0x18] sm:$0xff] %v1064_v46   ;;  %v718_v61 = vmul.f32 %v656_v41, %v656_v41 }
 0x107   : > { %1087 = vst [vmem:[%s1255_s17 + $0x10] sm:$0xff] %v1059_v49   ;;  %v702_v54 = vadd.f32 %v701_v50, %v655_v25  ;;  %v723_v56 = vadd.f32 %v722_v45, %v716_v51 }
 0x108   : > { %v782_v52 = vrot.slane %v781_v47, 2  ;;  %v803_v53 = vadd.f32 %v802_v48, %v801_v43 }
 0x109   : > { %v703_v59 = vadd.f32 %v702_v54, %v656_v41  ;;  %v724_v60 = vadd.f32 %v723_v56, %v717_v55 }
 0x10a   : > { %v783_v57 = vadd.f32 %v782_v52, %v781_v47  ;;  %v804_v58 = vrot.slane %v803_v53, 2 }
 0x10b   : > { %v704_v0 = vrot.slane %v703_v59, 4  ;;  %v725_v1 = vadd.f32 %v724_v60, %v718_v61 }
 0x10c   : > { %v784_v62 = vrot.slane %v783_v57, 1  ;;  %v805_v63 = vadd.f32 %v804_v58, %v803_v53 }
 0x10d   : > { %v705_v4 = vadd.f32 %v704_v0, %v703_v59  ;;  %v726_v5 = vrot.slane %v725_v1, 4 }
 0x10e   : > { %v785_v2 = vadd.f32 %v784_v62, %v783_v57  ;;  %v806_v3 = vrot.slane %v805_v63, 1 }
 0x10f   : > { %v706_v7 = vrot.slane %v705_v4, 2  ;;  %v727_v8 = vadd.f32 %v726_v5, %v725_v1 }
 0x110   : > { %786 = vst [vmem:[%s284_s23] sm:$0x1] %v785_v2  ;;  %v807_v6 = vadd.f32 %v806_v3, %v805_v63 }
 0x111   : > { %v707_v9 = vadd.f32 %v706_v7, %v705_v4  ;;  %v728_v10 = vrot.slane %v727_v8, 2 }
 0x112   : > { %808 = vst [vmem:[%s284_s23 + $0x1] sm:$0x1] %v807_v6 }
 0x113   : > { %v708_v11 = vrot.slane %v707_v9, 1  ;;  %v729_v12 = vadd.f32 %v728_v10, %v727_v8 }
 0x115   : > { %v709_v13 = vadd.f32 %v708_v11, %v707_v9  ;;  %v730_v14 = vrot.slane %v729_v12, 1 }
 0x117   : > { %710 = vst [vmem:[%s275_s25] sm:$0x1] %v709_v13  ;;  %v731_v15 = vadd.f32 %v730_v14, %v729_v12 }
 0x119   : > { %732 = vst [vmem:[%s275_s25 + $0x1] sm:$0x1] %v731_v15 }
 0x11a PF: > { %s17_s21 = sadd.s32 1, %s1157_s21  }
 0x11b   : > { %p14_p4 = scmp.ge.s32.totalorder %s17_s21, 4  }
 0x11d   :  { %16 = sbr.rel (!%p14_p4) target bundleno = 1 (0x1), region = 100 }

// kernel: basic_block_forward.5
= control target key start
LH: loop header
LB: loop body
LE: loop exit
PB: predicated region body
PF: predicated region fallthrough
CT: control target
= control target key end

     0   :  { %s528_s0 = inlined_call_operand.vmem [shape: bf16[128,128], index: 0, kind: input, shape index: {}]   ;;  %s529_s1 = inlined_call_operand.vmem [shape: f32[1,128], index: 1, kind: input, shape index: {}]   ;;  %s530_s2 = inlined_call_operand.vmem [shape: f32[1,128], index: 2, kind: input, shape index: {}]   ;;  %s531_s3 = inlined_call_operand.vmem [shape: bf16[128,128], index: 3, kind: input, shape index: {}]   ;;  %s532_s4 = inlined_call_operand.vmem [shape: f32[1,128], index: 4, kind: input, shape index: {}]   ;;  %s533_s5 = inlined_call_operand.vmem [shape: f32[1,128], index: 5, kind: input, shape index: {}]   ;;  %s534_s6 = inlined_call_operand.vmem [shape: f32[128,128], index: 6, kind: output, shape index: {}]  }
   0x1   :  { %v236_v0 = vld [vmem:[%s528_s0] sm:$0xff]   ;;  %v299_v9 = vld [vmem:[%s528_s0 + $0x8] sm:$0xff]   ;;  %v300_v11 = vld [vmem:[%s528_s0 + $0x10] sm:$0xff]  }
   0x2   :  { %v268_v1 = vld [vmem:[%s531_s3] sm:$0xff]   ;;  %v237_v3 = vunpack.c.l.bf16 %v236_v0  ;;  %v238_v7 = vunpack.c.h.bf16 %v236_v0  ;;  %v306_v10 = vld [vmem:[%s531_s3 + $0x8] sm:$0xff]   ;;  %v307_v16 = vld [vmem:[%s531_s3 + $0x10] sm:$0xff]   ;;  %v241_v17 = vunpack.c.l.bf16 %v299_v9  ;;  %v242_v19 = vunpack.c.h.bf16 %v299_v9 }
   0x3   :  { %v357_v2 = vld [vmem:[%s529_s1] ss:$0 sm:$0xff]  ;;  %v269_v4 = vunpack.c.l.bf16 %v268_v1  ;;  %v270_v8 = vunpack.c.h.bf16 %v268_v1  ;;  %v273_v18 = vunpack.c.l.bf16 %v306_v10  ;;  %v274_v20 = vunpack.c.h.bf16 %v306_v10  ;;  %v301_v30 = vld [vmem:[%s528_s0 + $0x18] sm:$0xff]  }
   0x4   :  { %v362_v5 = vld [vmem:[%s530_s2] ss:$0 sm:$0xff]  ;;  %v94_v12 = vmul.f32 %v237_v3, %v357_v2  ;;  %v95_v14 = vmul.f32 %v238_v7, %v357_v2  ;;  %v245_v23 = vunpack.c.l.bf16 %v300_v11  ;;  %v277_v24 = vunpack.c.l.bf16 %v307_v16  ;;  %v308_v39 = vld [vmem:[%s531_s3 + $0x18] sm:$0xff]   ;;  %v303_v3 = vld [vmem:[%s528_s0 + $0x28] sm:$0xff]  }
   0x5   :  { %v367_v6 = vld [vmem:[%s532_s4] ss:$0 sm:$0xff]  ;;  %v96_v26 = vmul.f32 %v241_v17, %v357_v2  ;;  %v97_v28 = vmul.f32 %v242_v19, %v357_v2  ;;  %v246_v37 = vunpack.c.h.bf16 %v300_v11  ;;  %v278_v38 = vunpack.c.h.bf16 %v307_v16 }
   0x6   :  { %v140_v13 = vmul.f32 %v269_v4, %v367_v6  ;;  %v141_v15 = vmul.f32 %v270_v8, %v367_v6  ;;  %v117_v21 = vadd.f32 %v362_v5, %v94_v12  ;;  %v118_v22 = vadd.f32 %v362_v5, %v95_v14  ;;  %v390_v25 = vld [vmem:[%s533_s5] ss:$0 sm:$0xff]  ;;  %v310_v14 = vld [vmem:[%s531_s3 + $0x28] sm:$0xff]  }
   0x7   :  { %v142_v27 = vmul.f32 %v273_v18, %v367_v6  ;;  %v143_v29 = vmul.f32 %v274_v20, %v367_v6  ;;  %v98_v33 = vmul.f32 %v245_v23, %v357_v2  ;;  %v144_v34 = vmul.f32 %v277_v24, %v367_v6  ;;  %v302_v56 = vld [vmem:[%s528_s0 + $0x20] sm:$0xff]  }
   0x8   :  { %v156_v31 = vadd.f32 %v140_v13, %v117_v21  ;;  %v157_v32 = vadd.f32 %v141_v15, %v118_v22  ;;  %v119_v35 = vadd.f32 %v362_v5, %v96_v26  ;;  %v120_v36 = vadd.f32 %v362_v5, %v97_v28  ;;  %v309_v61 = vld [vmem:[%s531_s3 + $0x20] sm:$0xff]   ;;  %v304_v28 = vld [vmem:[%s528_s0 + $0x30] sm:$0xff]  }
   0x9   :  { %v121_v42 = vadd.f32 %v362_v5, %v98_v33  ;;  %v249_v43 = vunpack.c.l.bf16 %v301_v30  ;;  %v99_v46 = vmul.f32 %v246_v37, %v357_v2  ;;  %v145_v47 = vmul.f32 %v278_v38, %v367_v6  ;;  %v311_v33 = vld [vmem:[%s531_s3 + $0x30] sm:$0xff]  }
   0xa   :  { %v179_v40 = vadd.f32 %v390_v25, %v156_v31  ;;  %v180_v41 = vadd.f32 %v390_v25, %v157_v32  ;;  %v158_v44 = vadd.f32 %v142_v27, %v119_v35  ;;  %v159_v45 = vadd.f32 %v143_v29, %v120_v36 }
   0xb   :  { %v160_v50 = vadd.f32 %v144_v34, %v121_v42  ;;  %v281_v51 = vunpack.c.l.bf16 %v308_v39  ;;  %v122_v54 = vadd.f32 %v362_v5, %v99_v46  ;;  %v100_v55 = vmul.f32 %v249_v43, %v357_v2 }
   0xc   :  { %v195_v48 = vmax.f32 %v179_v40, 0.0  ;;  %v196_v49 = vmax.f32 %v180_v41, 0.0  ;;  %v181_v52 = vadd.f32 %v390_v25, %v158_v44  ;;  %v182_v53 = vadd.f32 %v390_v25, %v159_v45 }
   0xd   :  { %v183_v57 = vadd.f32 %v390_v25, %v160_v50  ;;  %v146_v58 = vmul.f32 %v281_v51, %v367_v6  ;;  %v250_v59 = vunpack.c.h.bf16 %v301_v30  ;;  %v282_v60 = vunpack.c.h.bf16 %v308_v39  ;;  %v305_v50 = vld [vmem:[%s528_s0 + $0x38] sm:$0xff]  }
   0xe   :  { %211 = vst [vmem:[%s534_s6] sm:$0xff] %v195_v48  ;;  %212 = vst [vmem:[%s534_s6 + $0x8] sm:$0xff] %v196_v49  ;;  %v197_v62 = vmax.f32 %v181_v52, 0.0  ;;  %v198_v63 = vmax.f32 %v182_v53, 0.0  ;;  %v161_v0 = vadd.f32 %v145_v47, %v122_v54  ;;  %v123_v1 = vadd.f32 %v362_v5, %v100_v55  ;;  %v312_v51 = vld [vmem:[%s531_s3 + $0x38] sm:$0xff]  }
   0xf   :  { %v199_v4 = vmax.f32 %v183_v57, 0.0  ;;  %v101_v7 = vmul.f32 %v250_v59, %v357_v2  ;;  %v147_v8 = vmul.f32 %v282_v60, %v367_v6  ;;  %v253_v9 = vunpack.c.l.bf16 %v302_v56 }
  0x10   :  { %213 = vst [vmem:[%s534_s6 + $0x10] sm:$0xff] %v197_v62  ;;  %214 = vst [vmem:[%s534_s6 + $0x18] sm:$0xff] %v198_v63  ;;  %v184_v10 = vadd.f32 %v390_v25, %v161_v0  ;;  %v162_v11 = vadd.f32 %v146_v58, %v123_v1  ;;  %v285_v12 = vunpack.c.l.bf16 %v309_v61  ;;  %v254_v13 = vunpack.c.h.bf16 %v302_v56 }
  0x11   :  { %215 = vst [vmem:[%s534_s6 + $0x20] sm:$0xff] %v199_v4  ;;  %v124_v15 = vadd.f32 %v362_v5, %v101_v7  ;;  %v102_v16 = vmul.f32 %v253_v9, %v357_v2  ;;  %v286_v17 = vunpack.c.h.bf16 %v309_v61  ;;  %v257_v18 = vunpack.c.l.bf16 %v303_v3 }
  0x12   :  { %v200_v19 = vmax.f32 %v184_v10, 0.0  ;;  %v185_v20 = vadd.f32 %v390_v25, %v162_v11  ;;  %v148_v21 = vmul.f32 %v285_v12, %v367_v6  ;;  %v103_v22 = vmul.f32 %v254_v13, %v357_v2 }
  0x13   :  { %v163_v23 = vadd.f32 %v147_v8, %v124_v15  ;;  %v125_v24 = vadd.f32 %v362_v5, %v102_v16  ;;  %v149_v26 = vmul.f32 %v286_v17, %v367_v6  ;;  %v289_v27 = vunpack.c.l.bf16 %v310_v14 }
  0x14   :  { %216 = vst [vmem:[%s534_s6 + $0x28] sm:$0xff] %v200_v19  ;;  %v201_v29 = vmax.f32 %v185_v20, 0.0  ;;  %v126_v30 = vadd.f32 %v362_v5, %v103_v22  ;;  %v104_v31 = vmul.f32 %v257_v18, %v357_v2  ;;  %v258_v32 = vunpack.c.h.bf16 %v303_v3 }
  0x15   :  { %v186_v34 = vadd.f32 %v390_v25, %v163_v23  ;;  %v164_v35 = vadd.f32 %v148_v21, %v125_v24  ;;  %v150_v36 = vmul.f32 %v289_v27, %v367_v6  ;;  %v290_v37 = vunpack.c.h.bf16 %v310_v14 }
  0x16   :  { %217 = vst [vmem:[%s534_s6 + $0x30] sm:$0xff] %v201_v29  ;;  %v165_v38 = vadd.f32 %v149_v26, %v126_v30  ;;  %v127_v39 = vadd.f32 %v362_v5, %v104_v31  ;;  %v105_v40 = vmul.f32 %v258_v32, %v357_v2  ;;  %v261_v41 = vunpack.c.l.bf16 %v304_v28 }
  0x17   :  { %v202_v42 = vmax.f32 %v186_v34, 0.0  ;;  %v187_v43 = vadd.f32 %v390_v25, %v164_v35  ;;  %v151_v44 = vmul.f32 %v290_v37, %v367_v6  ;;  %v293_v45 = vunpack.c.l.bf16 %v311_v33 }
  0x18   :  { %v188_v46 = vadd.f32 %v390_v25, %v165_v38  ;;  %v166_v47 = vadd.f32 %v150_v36, %v127_v39  ;;  %v128_v48 = vadd.f32 %v362_v5, %v105_v40  ;;  %v106_v49 = vmul.f32 %v261_v41, %v357_v2 }
  0x19   :  { %218 = vst [vmem:[%s534_s6 + $0x38] sm:$0xff] %v202_v42  ;;  %v203_v52 = vmax.f32 %v187_v43, 0.0  ;;  %v152_v53 = vmul.f32 %v293_v45, %v367_v6  ;;  %v262_v54 = vunpack.c.h.bf16 %v304_v28  ;;  %v294_v55 = vunpack.c.h.bf16 %v311_v33 }
  0x1a   :  { %v204_v56 = vmax.f32 %v188_v46, 0.0  ;;  %v189_v57 = vadd.f32 %v390_v25, %v166_v47  ;;  %v167_v58 = vadd.f32 %v151_v44, %v128_v48  ;;  %v129_v59 = vadd.f32 %v362_v5, %v106_v49 }
  0x1b   :  { %219 = vst [vmem:[%s534_s6 + $0x40] sm:$0xff] %v203_v52  ;;  %v107_v60 = vmul.f32 %v262_v54, %v357_v2  ;;  %v153_v61 = vmul.f32 %v294_v55, %v367_v6  ;;  %v265_v62 = vunpack.c.l.bf16 %v305_v50  ;;  %v297_v63 = vunpack.c.l.bf16 %v312_v51 }
  0x1c   :  { %220 = vst [vmem:[%s534_s6 + $0x48] sm:$0xff] %v204_v56  ;;  %v205_v0 = vmax.f32 %v189_v57, 0.0  ;;  %v190_v1 = vadd.f32 %v390_v25, %v167_v58  ;;  %v168_v3 = vadd.f32 %v152_v53, %v129_v59  ;;  %v266_v4 = vunpack.c.h.bf16 %v305_v50 }
  0x1d   :  { %v130_v7 = vadd.f32 %v362_v5, %v107_v60  ;;  %v108_v8 = vmul.f32 %v265_v62, %v357_v2  ;;  %v154_v9 = vmul.f32 %v297_v63, %v367_v6  ;;  %v298_v10 = vunpack.c.h.bf16 %v312_v51 }
  0x1e   :  { %221 = vst [vmem:[%s534_s6 + $0x50] sm:$0xff] %v205_v0  ;;  %v206_v11 = vmax.f32 %v190_v1, 0.0  ;;  %v191_v12 = vadd.f32 %v390_v25, %v168_v3  ;;  %v109_v13 = vmul.f32 %v266_v4, %v357_v2 }
  0x1f   :  { %v169_v14 = vadd.f32 %v153_v61, %v130_v7  ;;  %v131_v15 = vadd.f32 %v362_v5, %v108_v8  ;;  %v155_v16 = vmul.f32 %v298_v10, %v367_v6 }
  0x20   :  { %222 = vst [vmem:[%s534_s6 + $0x58] sm:$0xff] %v206_v11  ;;  %v207_v17 = vmax.f32 %v191_v12, 0.0  ;;  %v132_v18 = vadd.f32 %v362_v5, %v109_v13 }
  0x21   :  { %v192_v19 = vadd.f32 %v390_v25, %v169_v14  ;;  %v170_v20 = vadd.f32 %v154_v9, %v131_v15 }
  0x22   :  { %223 = vst [vmem:[%s534_s6 + $0x60] sm:$0xff] %v207_v17  ;;  %v171_v2 = vadd.f32 %v155_v16, %v132_v18 }
  0x23   :  { %v208_v21 = vmax.f32 %v192_v19, 0.0  ;;  %v193_v22 = vadd.f32 %v390_v25, %v170_v20 }
  0x24   :  { %v194_v6 = vadd.f32 %v390_v25, %v171_v2 }
  0x25   :  { %224 = vst [vmem:[%s534_s6 + $0x68] sm:$0xff] %v208_v21  ;;  %v209_v23 = vmax.f32 %v193_v22, 0.0 }
  0x26   :  { %v210_v24 = vmax.f32 %v194_v6, 0.0 }
  0x27   :  { %225 = vst [vmem:[%s534_s6 + $0x70] sm:$0xff] %v209_v23 }
  0x28   :  { %226 = vst [vmem:[%s534_s6 + $0x78] sm:$0xff] %v210_v24 }

// kernel: basic_block_forward.4
= control target key start
LH: loop header
LB: loop body
LE: loop exit
PB: predicated region body
PF: predicated region fallthrough
CT: control target
= control target key end

     0   :  { %s916_s12 = smov 0   ;;  %s999_s0 = inlined_call_operand.vmem [shape: bf16[2,1,80,24], index: 0, kind: input, shape index: {}]   ;;  %s1000_s1 = inlined_call_operand.vmem [shape: bf16[3,24,128], index: 1, kind: input, shape index: {}]   ;;  %s1001_s2 = inlined_call_operand.vmem [shape: bf16[2,64,128], index: 2, kind: output, shape index: {0}]   ;;  %s1002_s3 = inlined_call_operand.vmem [shape: f32[2,2,128], index: 3, kind: output, shape index: {1}]  }
   0x1 LB: > { %s696_s13 = sadd.s32 4294967295, %s894_s12   ;;  %p700_p0 = scmp.ge.s32.totalorder %s894_s12, 1  ;;  %s894_s12 = sphi %s916_s12, %s14_s12  }
   0x2   : > { %p140_p1 = scmp.lt.s32.totalorder %s894_s12, 3 }
   0x4   : > { %p141_p2 = pnand %p700_p0, %p140_p1 }
   0x5   : > { %v870_v0 = vld [vmem:[%s1000_s1 + $0xc] sm:$0xff] (!%p141_p2)   ;;  %vm241_vm0 = vcmask (!%p141_p2), 1043456   ;;  %v871_v1 = vld [vmem:[%s1000_s1] sm:$0xff] (!%p141_p2)   ;;  %p168_p3 = scmp.lt.s32.totalorder (!%p141_p2), %s696_s13, 1  ;;  %v872_v2 = vld [vmem:[%s1000_s1 + $0x14] ss:$0 sps:$4 sm:$0xff] (!%p141_p2)  }
   0x6   : > { %144 = sbr.rel (%p141_p2) target bundleno = 280 (0x118), region = 28  ;;  %801 = vmatprep.subr.bf16.mxu1 (!%p141_p2), %v870_v0  ;;  %813 = vmatprep.subr.bf16.mxu0 (!%p141_p2), %v871_v1  ;;  %v873_v3 = vld [vmem:[%s1000_s1 + $0x8] ss:$0 sps:$4 sm:$0xff] (!%p141_p2)   ;;  %v243_v4 = vsel (!%p141_p2), %vm241_vm0, %v872_v2, 0  ;;  %v878_v6 = vld [vmem:[%s1000_s1 + $0x18] sm:$0xff] (!%p141_p2)   ;;  %vm228_vm1 = vcmask (!%p141_p2), 195584  }
   0x7   : > { %802 = vmatpush3.bf16.msra.mxu1 (!%p141_p2), %v870_v0  ;;  %814 = vmatpush3.bf16.msra.mxu0 (!%p141_p2), %v871_v1  ;;  %v338_v5 = vsel (!%p141_p2), %vm241_vm0, %v873_v3, 0  ;;  %v879_v17 = vld [vmem:[%s1000_s1 + $0x20] ss:$0 sps:$4 sm:$0xff] (!%p141_p2)  }
   0x8   : > { %857 = vmatprep.subr.msk.bf16.mxu1 (!%p141_p2), %vm241_vm0, %v872_v2  ;;  %858 = vmatprep.subr.msk.bf16.mxu0 (!%p141_p2), %vm241_vm0, %v873_v3  ;;  %v459_v23 = vsel (!%p141_p2), %vm241_vm0, %v879_v17, 0 }
   0xb   : > { %804 = vmatpush3.bf16.msra.mxu1 (!%p141_p2), %v243_v4  ;;  %816 = vmatpush3.bf16.msra.mxu0 (!%p141_p2), %v338_v5 }
   0xc   : > { %837 = vmatprep.subr.bf16.mxu1 (!%p141_p2), %v871_v1  ;;  %825 = vmatprep.subr.bf16.mxu0 (!%p141_p2), %v878_v6 }
   0xd   : > { %s1004_s13 = smov (!%p168_p3, %s696_s13), 1 }
   0xe   : > { %s861_s22 = smul.u32 40, %s1004_s13  ;;  %s751_s30 = sshll.u32 %s1004_s13, 5 }
   0xf   : > { %s986_s6 = scalar_lea.vmem %s1001_s2, %s751_s30  ;;  %s704_s7 = sshll.u32 %s1004_s13, 1 }
  0x10   : > { %s949_s27 = scalar_lea.vmem %s999_s0, %s861_s22  ;;  %s181_s10 = scalar_lea.vmem %s1002_s3, %s704_s7 }
  0x11   : > { %v184_v7 = vld [vmem:[%s949_s27 + $0x4] sm:$0xf]  ;;  %v185_v8 = vld [vmem:[%s949_s27 + $0x8] sm:$0xf]  ;;  %v186_v9 = vld [vmem:[%s949_s27 + $0xc] sm:$0xf] }
  0x12   : > { %v187_v10 = vld [vmem:[%s949_s27 + $0x10] sm:$0xf]  ;;  %v708_v11 = vcombine.low %v184_v7, %v185_v8  ;;  %v719_v12 = vcombine.low %v185_v8, %v186_v9  ;;  %v183_v13 = vld [vmem:[%s949_s27] sm:$0xf]  ;;  %v188_v14 = vld [vmem:[%s949_s27 + $0x14] sm:$0xf] }
  0x13   : > { %v709_v15 = vcombine.low %v186_v9, %v187_v10  ;;  %v718_v16 = vcombine.low %v183_v13, %v184_v7  ;;  %v189_v18 = vld [vmem:[%s949_s27 + $0x18] sm:$0xf]  ;;  %v190_v20 = vld [vmem:[%s949_s27 + $0x1c] sm:$0xf]  ;;  %v883_v21 = vld [vmem:[%s949_s27 + $0x8] sm:$0xff]   ;;  %v720_v25 = vcombine.low %v187_v10, %v188_v14 }
  0x14   : > { %805 = vmatprep.mubr.msk.bf16.mxu1 %vm228_vm1, %v708_v11  ;;  %v710_v19 = vcombine.low %v188_v14, %v189_v18  ;;  %v194_v22 = vld [vmem:[%s949_s27 + $0x20] sm:$0xf]  ;;  %v884_v26 = vld [vmem:[%s949_s27 + $0x10] sm:$0xff]   ;;  %v886_v27 = vld [vmem:[%s949_s27 + $0x18] sm:$0xff]   ;;  %v721_v28 = vcombine.low %v189_v18, %v190_v20 }
  0x15   : > { %817 = vmatprep.mubr.msk.bf16.mxu0 %vm228_vm1, %v718_v16  ;;  %806 = vmatmul.mubr.msk.bf16.vlgmr.msra.gmra.mrb[0].mxu1 %vm228_vm1, %v709_v15  ;;  %v711_v24 = vcombine.low %v190_v20, %v194_v22  ;;  %v887_v29 = vld [vmem:[%s949_s27 + $0x20] sm:$0xff]  }
  0x16   : > { %818 = vmatmul.mubr.msk.bf16.vlgmr.msra.gmra.mrb[0].mxu0 %vm228_vm1, %v719_v12  ;;  %839 = vmatpush3.bf16.msra.mxu1 %v871_v1 }
  0x17   : > { %826 = vmatpush3.bf16.msra.mxu0 %v878_v6  ;;  %809 = vmatprep.mubr.msk.bf16.mxu1 %vm228_vm1, %v710_v19 }
  0x18   : > { %860 = vmatprep.subr.msk.bf16.mxu0 %vm241_vm0, %v879_v17  ;;  %859 = vmatprep.subr.msk.bf16.mxu1 %vm241_vm0, %v873_v3 }
  0x19   : > { %829 = vmatprep.mubr.msk.bf16.mxu0 %vm228_vm1, %v883_v21 }
  0x1a   : > { %840 = vmatpush3.bf16.msra.mxu1 %v338_v5 }
  0x1b   : > { %828 = vmatpush3.bf16.msra.mxu0 %v459_v23 }
  0x1d   : > { %810 = vmatmul.mubr.msk.bf16.gmra.mrb[4].mxu1 %vm228_vm1, %v711_v24 }
  0x1e   : > { %821 = vmatprep.mubr.msk.bf16.mxu1 %vm228_vm1, %v720_v25 }
  0x22   : > { %830 = vmatmul.mubr.msk.bf16.vlgmr.msra.gmra.mrb[0].mxu0 %vm228_vm1, %v884_v26 }
  0x23   : > { %833 = vmatprep.mubr.msk.bf16.mxu0 %vm228_vm1, %v886_v27 }
  0x29   : > { %822 = vmatmul.mubr.msk.bf16.vlgmr.msra.gmra.mrb[4].mxu1 %vm228_vm1, %v721_v28 }
  0x2a   : > { %834 = vmatmul.mubr.msk.bf16.gmra.mrb[4].mxu0 %vm228_vm1, %v887_v29 }
  0xe8   : > { %v807_v30 = vpop.f32.mrb[0].mxu1 }
  0xe9   : > { %v279_v31 = vpop.f32.mrb[1].mxu1 }
  0xea   : > { %v808_v32 = vpop.f32.mrb[2].mxu1 }
  0xeb   : > { %v282_v33 = vpop.f32.mrb[3].mxu1 }
  0xf5   : > { %v831_v34 = vpop.f32.mrb[0].mxu0 }
  0xf6   : > { %v841_v35 = vadd.f32 %v831_v34, %v807_v30  ;;  %v495_v36 = vpop.f32.mrb[1].mxu0 }
  0xf7   : > { %v842_v37 = vadd.f32 %v495_v36, %v279_v31  ;;  %v832_v38 = vpop.f32.mrb[2].mxu0 }
  0xf8   : > { %v843_v39 = vadd.f32 %v832_v38, %v808_v32  ;;  %v498_v40 = vpop.f32.mrb[3].mxu0  ;;  %v590_v48 = vmul.f32 %v841_v35, %v841_v35 }
  0xf9   : > { %v844_v41 = vadd.f32 %v498_v40, %v282_v33  ;;  %v588_v43 = vmul.f32 %v842_v37, %v842_v37 }
  0xfa   : > { %v768_v42 = vpack.c.bf16 %v843_v39, %v841_v35  ;;  %v591_v56 = vmul.f32 %v843_v39, %v843_v39 }
  0xfb   : > { %v763_v44 = vpack.c.bf16 %v844_v41, %v842_v37  ;;  %v574_v45 = vadd.f32 %v844_v41, %v842_v37  ;;  %v589_v46 = vmul.f32 %v844_v41, %v844_v41 }
  0xfc   : > { %780 = vst [vmem:[%s986_s6 + $0x8] sm:$0xff] %v768_v42   ;;  %v823_v47 = vpop.f32.mrb[4].mxu1 }
  0xfd   : > { %764 = vst [vmem:[%s986_s6] sm:$0xff] %v763_v44   ;;  %v575_v49 = vadd.f32 %v841_v35, %v574_v45  ;;  %v596_v50 = vadd.f32 %v589_v46, %v588_v43  ;;  %v835_v51 = vpop.f32.mrb[4].mxu0  ;;  %v390_v52 = vpop.f32.mrb[5].mxu1 }
  0xfe   : > { %v845_v53 = vadd.f32 %v835_v51, %v823_v47  ;;  %v511_v54 = vpop.f32.mrb[5].mxu0  ;;  %v824_v55 = vpop.f32.mrb[6].mxu1 }
  0xff   : > { %v597_v57 = vadd.f32 %v596_v50, %v590_v48  ;;  %v846_v58 = vadd.f32 %v511_v54, %v390_v52  ;;  %v576_v59 = vadd.f32 %v843_v39, %v575_v49  ;;  %v836_v60 = vpop.f32.mrb[6].mxu0  ;;  %v393_v61 = vpop.f32.mrb[7].mxu1 }
 0x100   : > { %v847_v62 = vadd.f32 %v836_v60, %v824_v55  ;;  %v514_v63 = vpop.f32.mrb[7].mxu0  ;;  %v594_v9 = vmul.f32 %v845_v53, %v845_v53 }
 0x101   : > { %v577_v0 = vadd.f32 %v846_v58, %v576_v59  ;;  %v592_v1 = vmul.f32 %v846_v58, %v846_v58  ;;  %v598_v2 = vadd.f32 %v597_v57, %v591_v56  ;;  %v848_v3 = vadd.f32 %v514_v63, %v393_v61 }
 0x102   : > { %v778_v4 = vpack.c.bf16 %v847_v62, %v845_v53  ;;  %v595_v12 = vmul.f32 %v847_v62, %v847_v62 }
 0x103   : > { %v599_v5 = vadd.f32 %v598_v2, %v592_v1  ;;  %v773_v6 = vpack.c.bf16 %v848_v3, %v846_v58  ;;  %v578_v7 = vadd.f32 %v848_v3, %v577_v0  ;;  %v593_v8 = vmul.f32 %v848_v3, %v848_v3 }
 0x104   : > { %782 = vst [vmem:[%s986_s6 + $0x18] sm:$0xff] %v778_v4  }
 0x105   : > { %781 = vst [vmem:[%s986_s6 + $0x10] sm:$0xff] %v773_v6   ;;  %v579_v10 = vadd.f32 %v845_v53, %v578_v7  ;;  %v600_v11 = vadd.f32 %v599_v5, %v593_v8 }
 0x107   : > { %v580_v13 = vadd.f32 %v847_v62, %v579_v10  ;;  %v601_v14 = vadd.f32 %v600_v11, %v594_v9 }
 0x109   : > { %v581_v15 = vrot.slane %v580_v13, 4  ;;  %v602_v16 = vadd.f32 %v601_v14, %v595_v12 }
 0x10b   : > { %v582_v17 = vadd.f32 %v581_v15, %v580_v13  ;;  %v603_v18 = vrot.slane %v602_v16, 4 }
 0x10d   : > { %v583_v19 = vrot.slane %v582_v17, 2  ;;  %v604_v20 = vadd.f32 %v603_v18, %v602_v16 }
 0x10f   : > { %v584_v21 = vadd.f32 %v583_v19, %v582_v17  ;;  %v605_v22 = vrot.slane %v604_v20, 2 }
 0x111   : > { %v585_v23 = vrot.slane %v584_v21, 1  ;;  %v606_v24 = vadd.f32 %v605_v22, %v604_v20 }
 0x113   : > { %v586_v25 = vadd.f32 %v585_v23, %v584_v21  ;;  %v607_v26 = vrot.slane %v606_v24, 1 }
 0x115   : > { %587 = vst [vmem:[%s181_s10] sm:$0x1] %v586_v25  ;;  %v608_v27 = vadd.f32 %v607_v26, %v606_v24 }
 0x117   : > { %609 = vst [vmem:[%s181_s10 + $0x1] sm:$0x1] %v608_v27 }
 0x118 PF: > { %s14_s12 = sadd.s32 1, %s894_s12  }
 0x119   : > { %p11_p4 = scmp.ge.s32.totalorder %s14_s12, 4  }
 0x11b   :  { %13 = sbr.rel (!%p11_p4) target bundleno = 1 (0x1), region = 72 }

</bundles_post_ra>
